<compile_context>
chip_gen: v7x
topology: tpu7x:2x2x1
jax: 0.10.0
libtpu: 0.0.40
codegen_flags: <defaults>
</compile_context>

<pallas_src>
import functools
import math

import jax
import jax.numpy as jnp
import numpy as np
from jax.experimental import pallas as pl
from jax.experimental.pallas import tpu as pltpu


# Conservative per-step VMEM working-set budget for the tile picker: leaves
# headroom inside v7x's 64 MiB physical VMEM while still letting v5e/v6e
# (128 MiB) run at the big-tile roofline for typical H.
_VMEM_BUDGET_BYTES = 20 << 20


def _round_up(x, m):
    return ((x + m - 1) // m) * m


def _vmem_estimate_bytes(tb, ts, H, io_bytes):
    """Rough per-step VMEM footprint: double-buffered I/O blocks, the
    (double-buffered) grid-invariant weight blocks, the qproj scratch and the
    f32 intermediates (rproj + its transposed / tanh copies)."""
    blk_io = 2 * tb * ts * H * io_bytes              # ref in + ref_proj out
    blk_small = tb * H * io_bytes + tb * ts * 4      # query in + logits out
    dbuf = 2 * (blk_io + blk_small)                  # pipeline double-buffering
    weights = 2 * (2 * H * H * io_bytes + 3 * max(H, 128) * 4)
    scratch = tb * H * 4
    interm = 3 * tb * ts * H * 4
    return dbuf + weights + scratch + interm


def _pick_tiles(B, S, H, io_bytes, budget=_VMEM_BUDGET_BYTES):
    """VMEM-budget-aware (tb, ts) picker.  S must be a multiple of 8.

    Legality: the 2-D query/logits blocks need tb % 8 == 0 or tb == B, and the
    logits / [B,H,S]-layout ref_proj blocks need ts % 128 == 0 or ts == S.
    Perf: pick the biggest tb*ts block that fits the budget (amortizes the
    ~0.35us per-step overhead, gives the MXU a tall M) and keep >= 2 batch grid
    steps when B >= 16 so the "parallel" axis can feed both v7x TensorCores.
    """
    ts_cands = ([S] if S <= 4096 else []) + \
               [d for d in range(min(S, 4096), 127, -128) if S % d == 0]
    if not ts_cands:
        ts_cands = [S]

    if B <= 8:
        tb_cands = [B]
    else:
        cap = min(128, B // 2) if B >= 16 else min(128, B)
        tb_cands = [d for d in range(cap, 7, -1) if B % d == 0 and d % 8 == 0]
        if not tb_cands:
            tb_cands = [B]        # single batch step; full-dim block stays legal

    best = None
    for tb in tb_cands:
        for ts in ts_cands:
            if _vmem_estimate_bytes(tb, ts, H, io_bytes) > budget:
                continue
            if best is None or tb * ts > best[0] * best[1]:
                best = (tb, ts)
    if best is None:              # nothing fits the budget: smallest legal tiles
        best = (tb_cands[-1], ts_cands[-1])
    return best


def _attention_kernel(q_ref, ref_ref, wqT_ref, bq_ref, wcT_ref, bc_ref, v_ref,
                      refout_ref, logits_ref, qproj_sc,
                      *, use_tanh, C, tb, ts, out_is_bhs):
    # Per-grid-step shapes:
    #   q_ref    (TB, H)  io dtype     ref_ref  (TB, TS, H) io dtype
    #   wqT_ref  (H, H)   io dtype     bq_ref   (1, H)  f32
    #   wcT_ref  (H, H)   io dtype     bc_ref   (1, H)  f32
    #   v_ref    (1, H)   f32
    #   refout_ref (TB, H, TS) or (TB, TS, H)   logits_ref (TB, TS) f32
    #   qproj_sc (TB, H) f32 scratch, lives across the S-tiles of a batch tile.
    H = wqT_ref.shape[0]

    # Query projection: once per batch tile (S is the inner "arbitrary" axis).
    @pl.when(pl.program_id(1) == 0)
    def _():
        qproj_sc[...] = (
            jnp.dot(q_ref[...], wqT_ref[...],
                    preferred_element_type=jnp.float32)
            + bq_ref[...])                                       # (TB, H) f32

    # Conv1d(kernel=1) over ref == ONE tall MXU matmul over all TB*TS rows.
    # ts % 8 == 0 is guaranteed by the wrapper (S padded), so this reshape is
    # a pure view (no relayout copy).
    r = ref_ref[...].reshape(tb * ts, H)
    rproj = (jnp.dot(r, wcT_ref[...], preferred_element_type=jnp.float32)
             + bc_ref[...])                                      # (TB*TS, H) f32

    qproj = qproj_sc[...]                                        # (TB, H) f32
    if out_is_bhs:
        # Lane axis = TS (lane-dense for TS >= 128): a single batched XLU
        # transpose yields the [TB, H, TS] slab that feeds BOTH the PyTorch
        # [B, H, S] ref_proj output and the logits reduction, so only one
        # layout of rproj stays live.
        rprojT = jnp.transpose(rproj.reshape(tb, ts, H), (0, 2, 1))  # (TB,H,TS)
        refout_ref[...] = rprojT.astype(refout_ref.dtype)
        t = jnp.tanh(qproj[:, :, None] + rprojT)                 # EUP, (TB,H,TS)
        logits = jnp.sum(t * v_ref[...].reshape(1, H, 1), axis=1)  # sublane red.
    else:
        # Small-S path (TS < 128): keep H on the lane axis so the largest
        # output stores lane-dense when H >= 128; the wrapper does the single
        # [B, H, S] permute outside the kernel.
        rproj3 = rproj.reshape(tb, ts, H)
        refout_ref[...] = rproj3.astype(refout_ref.dtype)
        t = jnp.tanh(qproj[:, None, :] + rproj3)                 # (TB, TS, H)
        logits = jnp.sum(t * v_ref[...][None], axis=-1)          # lane reduce

    if use_tanh:
        logits = C * jnp.tanh(logits)
    logits_ref[...] = logits.astype(logits_ref.dtype)


def attention_forward(query, ref, params, *, use_tanh=False, C=10.0,
                      io_dtype=None, tb=None, ts=None):
    """Bahdanau attention forward.

    query: [B, H], ref: [B, S, H]; params = (wqT, bq, wcT, bc, v) in kernel
    layout (see init_params).  Returns (ref_proj [B, H, S], logits [B, S])
    matching the PyTorch module.  io_dtype=jnp.bfloat16 halves the HBM bytes of
    the two dominant tensors (ref read + ref_proj write) and feeds the MXU
    bf16 inputs with f32 accumulation; logits and all element-wise math stay
    f32 (v5e's VPU/EUP have no bf16).
    """
    B, S, H = ref.shape
    io_dtype = jnp.dtype(ref.dtype if io_dtype is None else io_dtype)
    wqT, bq, wcT, bc, v = params

    query_io = query.astype(io_dtype)
    ref_io = ref.astype(io_dtype)
    wqT = wqT.astype(io_dtype)
    wcT = wcT.astype(io_dtype)
    bq = bq.astype(jnp.float32)
    bc = bc.astype(jnp.float32)
    v = v.astype(jnp.float32)

    # Pad S to a multiple of 8 so the in-kernel reshape of the ref block is a
    # pure view; padded columns are sliced off after the call.
    S_pad = _round_up(S, 8)
    if S_pad != S:
        ref_io = jnp.pad(ref_io, ((0, 0), (0, S_pad - S), (0, 0)))

    io_bytes = io_dtype.itemsize
    if tb is None or ts is None:
        tb_auto, ts_auto = _pick_tiles(B, S_pad, H, io_bytes)
        tb = tb_auto if tb is None else tb
        ts = ts_auto if ts is None else ts
    assert B % tb == 0 and S_pad % ts == 0

    # Output layout: emit [B, H, S] directly (transposed epilogue) whenever the
    # S tile is the wider lane axis; otherwise emit lane-dense [B, S, H] and do
    # the single permute outside the kernel.
    out_is_bhs = (ts >= 128) or (ts >= H)

    kernel = functools.partial(_attention_kernel, use_tanh=use_tanh,
                               C=float(C), tb=tb, ts=ts, out_is_bhs=out_is_bhs)

    if out_is_bhs:
        refout_shape = (B, H, S_pad)
        refout_spec = pl.BlockSpec((tb, H, ts), lambda b, s: (b, 0, s))
    else:
        refout_shape = (B, S_pad, H)
        refout_spec = pl.BlockSpec((tb, ts, H), lambda b, s: (b, s, 0))

    est = _vmem_estimate_bytes(tb, ts, H, io_bytes)
    vmem_limit = int(min(max(est * 5 // 4 + (8 << 20), 32 << 20), 64 << 20))

    # TODO(synk): on VMEM-tight chips (v7x at large H), mark the grid-invariant
    # weight/bias/V blocks pipeline_mode=pl.Buffered(1) (single-buffered) to
    # reclaim ~4*H^2*io_bytes of VMEM for larger ref tiles.
    refout, logits = pl.pallas_call(
        kernel,
        out_shape=(
            jax.ShapeDtypeStruct(refout_shape, io_dtype),
            jax.ShapeDtypeStruct((B, S_pad), jnp.float32),
        ),
        grid_spec=pltpu.PrefetchScalarGridSpec(
            num_scalar_prefetch=0,
            grid=(B // tb, S_pad // ts),
            in_specs=[
                pl.BlockSpec((tb, H), lambda b, s: (b, 0)),         # query
                pl.BlockSpec((tb, ts, H), lambda b, s: (b, s, 0)),  # ref
                pl.BlockSpec((H, H), lambda b, s: (0, 0)),          # W_query^T
                pl.BlockSpec((1, H), lambda b, s: (0, 0)),          # b_query
                pl.BlockSpec((H, H), lambda b, s: (0, 0)),          # W_ref^T
                pl.BlockSpec((1, H), lambda b, s: (0, 0)),          # b_ref
                pl.BlockSpec((1, H), lambda b, s: (0, 0)),          # V
            ],
            out_specs=[
                refout_spec,
                pl.BlockSpec((tb, ts), lambda b, s: (b, s)),        # logits
            ],
            scratch_shapes=[pltpu.VMEM((tb, H), jnp.float32)],      # cached qproj
        ),
        compiler_params=pltpu.CompilerParams(
            dimension_semantics=("parallel", "arbitrary"),
            vmem_limit_bytes=vmem_limit),
    )(query_io, ref_io, wqT, bq, wcT, bc, v)

    if S_pad != S:
        logits = logits[:, :S]
        refout = refout[:, :, :S] if out_is_bhs else refout[:, :S, :]
    if not out_is_bhs:
        refout = jnp.transpose(refout, (0, 2, 1))   # single XLA permute (small S)
    return refout, logits


def _reference_forward(query, ref, params, *, use_tanh=False, C=10.0):
    """Plain-JAX replica of the PyTorch forward, for correctness checking."""
    wqT, bq, wcT, bc, v = params
    qproj = query @ wqT + bq                              # [B, H]   (Linear)
    rproj = jnp.einsum("bsh,ho->bso", ref, wcT) + bc      # [B, S, H] (Conv1d k=1)
    t = jnp.tanh(qproj[:, None, :] + rproj)               # [B, S, H]
    logits = jnp.einsum("bsh,h->bs", t, v[0])             # [B, S]
    if use_tanh:
        logits = C * jnp.tanh(logits)
    return jnp.transpose(rproj, (0, 2, 1)), logits


def init_params(key, hidden_size):
    """Parameters in kernel layout (pre-transposed once).  Mapping to PyTorch:
        wqT = W_query.weight.T          bq = W_query.bias[None, :]
        wcT = W_ref.weight[:, :, 0].T   bc = W_ref.bias[None, :]
        v   = V[None, :]
    """
    k1, k2, k3, k4, k5 = jax.random.split(key, 5)
    bound = 1.0 / math.sqrt(hidden_size)
    wqT = jax.random.uniform(k1, (hidden_size, hidden_size), jnp.float32, -bound, bound)
    bq = jax.random.uniform(k2, (1, hidden_size), jnp.float32, -bound, bound)
    wcT = jax.random.uniform(k3, (hidden_size, hidden_size), jnp.float32, -bound, bound)
    bc = jax.random.uniform(k4, (1, hidden_size), jnp.float32, -bound, bound)
    v = jax.random.uniform(k5, (1, hidden_size), jnp.float32, -bound, bound)
    return (wqT, bq, wcT, bc, v)


if __name__ == "__main__":
    key = jax.random.PRNGKey(0)
    kp, kq, kr, kq2, kr2 = jax.random.split(key, 5)

    # Small shapes consistent with the module: batch=2, seq=8, hidden=32.
    B, S, H = 2, 8, 32
    params = init_params(kp, H)
    query = jax.random.normal(kq, (B, H), jnp.float32)
    ref = jax.random.normal(kr, (B, S, H), jnp.float32)

    # f32, no clipping (small-S lane-dense [B,S,H] store path).
    ref_out, logits = attention_forward(query, ref, params, use_tanh=False)
    jax.block_until_ready((ref_out, logits))
    ref_chk, log_chk = _reference_forward(query, ref, params, use_tanh=False)
    assert ref_out.shape == (B, H, S) and logits.shape == (B, S)
    np.testing.assert_allclose(np.asarray(ref_out), np.asarray(ref_chk),
                               rtol=1e-5, atol=1e-5)
    np.testing.assert_allclose(np.asarray(logits), np.asarray(log_chk),
                               rtol=1e-5, atol=1e-5)

    # f32 with the C * tanh logit clipping path.
    _, logits_t = attention_forward(query, ref, params, use_tanh=True, C=10.0)
    jax.block_until_ready(logits_t)
    _, log_t_chk = _reference_forward(query, ref, params, use_tanh=True, C=10.0)
    np.testing.assert_allclose(np.asarray(logits_t), np.asarray(log_t_chk),
                               rtol=1e-5, atol=1e-5)

    # f32 with a longer sequence: exercises the transposed [B, H, S] epilogue
    # (ts >= 128, lane-dense, no wrapper permute).
    S2 = 128
    query2 = jax.random.normal(kq2, (B, H), jnp.float32)
    ref2 = jax.random.normal(kr2, (B, S2, H), jnp.float32)
    ref_out2, logits2 = attention_forward(query2, ref2, params, use_tanh=False)
    jax.block_until_ready((ref_out2, logits2))
    ref2_chk, log2_chk = _reference_forward(query2, ref2, params, use_tanh=False)
    assert ref_out2.shape == (B, H, S2) and logits2.shape == (B, S2)
    np.testing.assert_allclose(np.asarray(ref_out2), np.asarray(ref2_chk),
                               rtol=1e-5, atol=1e-5)
    np.testing.assert_allclose(np.asarray(logits2), np.asarray(log2_chk),
                               rtol=1e-5, atol=1e-5)

    # bf16 I/O path: bf16 MXU inputs + bf16 ref_proj writeback, f32 epilogue.
    ref_bf, logits_bf = attention_forward(query2, ref2, params, use_tanh=False,
                                          io_dtype=jnp.bfloat16)
    jax.block_until_ready((ref_bf, logits_bf))
    assert ref_bf.dtype == jnp.bfloat16 and logits_bf.dtype == jnp.float32
    np.testing.assert_allclose(np.asarray(ref_bf.astype(jnp.float32)),
                               np.asarray(ref2_chk), rtol=5e-2, atol=5e-2)
    np.testing.assert_allclose(np.asarray(logits_bf), np.asarray(log2_chk),
                               rtol=5e-2, atol=5e-2)

    print("KERNEL_OK")
</pallas_src>

<mosaic_0001>
module attributes {stable_mosaic.version = 11 : i64} {
  func.func @_attention_kernel(%arg0: i32, %arg1: i32, %arg2: memref<2x32xf32, #tpu.memory_space<vmem>>, %arg3: memref<2x8x32xf32, #tpu.memory_space<vmem>>, %arg4: memref<32x32xf32, #tpu.memory_space<vmem>>, %arg5: memref<1x32xf32, #tpu.memory_space<vmem>>, %arg6: memref<32x32xf32, #tpu.memory_space<vmem>>, %arg7: memref<1x32xf32, #tpu.memory_space<vmem>>, %arg8: memref<1x32xf32, #tpu.memory_space<vmem>>, %arg9: memref<2x8x32xf32, #tpu.memory_space<vmem>>, %arg10: memref<2x8xf32, #tpu.memory_space<vmem>>, %arg11: memref<2x32xf32, #tpu.memory_space<vmem>>) attributes {dimension_semantics = [#tpu.dimension_semantics<parallel>, #tpu.dimension_semantics<arbitrary>], iteration_bounds = array<i64: 1, 1>, scalar_prefetch = 0 : i64, scratch_operands = 1 : i64, tpu.core_type = #tpu.core_type<tc>, window_params = [{transform_indices = @transform_0, window_bounds = array<i64: 2, 32>}, {transform_indices = @transform_1, window_bounds = array<i64: 2, 8, 32>}, {pipeline_mode = #tpu.pipeline_mode<synchronous>, transform_indices = @transform_2, window_bounds = array<i64: 32, 32>}, {pipeline_mode = #tpu.pipeline_mode<synchronous>, transform_indices = @transform_3, window_bounds = array<i64: 1, 32>}, {pipeline_mode = #tpu.pipeline_mode<synchronous>, transform_indices = @transform_4, window_bounds = array<i64: 32, 32>}, {pipeline_mode = #tpu.pipeline_mode<synchronous>, transform_indices = @transform_5, window_bounds = array<i64: 1, 32>}, {pipeline_mode = #tpu.pipeline_mode<synchronous>, transform_indices = @transform_6, window_bounds = array<i64: 1, 32>}, {transform_indices = @transform_7, window_bounds = array<i64: 2, 8, 32>}, {transform_indices = @transform_8, window_bounds = array<i64: 2, 8>}]} {
    %c0_i32 = arith.constant 0 : i32
    %0 = arith.cmpi eq, %arg1, %c0_i32 : i32
    %1 = arith.extui %0 : i1 to i32
    %c0_i32_0 = arith.constant 0 : i32
    %2 = arith.cmpi ne, %1, %c0_i32_0 : i32
    scf.if %2 {
      %c0_17 = arith.constant 0 : index
      %c0_18 = arith.constant 0 : index
      %23 = vector.load %arg2[%c0_17, %c0_18] : memref<2x32xf32, #tpu.memory_space<vmem>>, vector<2x32xf32>
      %c0_19 = arith.constant 0 : index
      %c0_20 = arith.constant 0 : index
      %24 = vector.load %arg4[%c0_19, %c0_20] : memref<32x32xf32, #tpu.memory_space<vmem>>, vector<32x32xf32>
      %cst_21 = arith.constant dense<0.000000e+00> : vector<2x32xf32>
      %25 = tpu.matmul %23, %24, %cst_21 {dimension_numbers = #tpu.dot_dimension_numbers<[1], [0], [0], [1], [0, 0, 1, 1], [], []>} : vector<2x32xf32>, vector<32x32xf32>, vector<2x32xf32> -> vector<2x32xf32>
      %c0_22 = arith.constant 0 : index
      %c0_23 = arith.constant 0 : index
      %26 = vector.load %arg5[%c0_22, %c0_23] : memref<1x32xf32, #tpu.memory_space<vmem>>, vector<1x32xf32>
      %27 = vector.broadcast %26 : vector<1x32xf32> to vector<2x32xf32>
      %28 = arith.addf %25, %27 : vector<2x32xf32>
      %c0_24 = arith.constant 0 : index
      %c0_25 = arith.constant 0 : index
      %29 = vector.load %arg11[%c0_24, %c0_25] : memref<2x32xf32, #tpu.memory_space<vmem>>, vector<2x32xf32>
      tpu.vector_store %arg11[%c0_24, %c0_25], %28 {strides = array<i32>} : memref<2x32xf32, #tpu.memory_space<vmem>>, vector<2x32xf32>,
    } else {
    }
    %c0 = arith.constant 0 : index
    %c0_1 = arith.constant 0 : index
    %c0_2 = arith.constant 0 : index
    %3 = vector.load %arg3[%c0, %c0_1, %c0_2] : memref<2x8x32xf32, #tpu.memory_space<vmem>>, vector<2x8x32xf32>
    %4 = vector.shape_cast %3 : vector<2x8x32xf32> to vector<16x32xf32>
    %c0_3 = arith.constant 0 : index
    %c0_4 = arith.constant 0 : index
    %5 = vector.load %arg6[%c0_3, %c0_4] : memref<32x32xf32, #tpu.memory_space<vmem>>, vector<32x32xf32>
    %cst = arith.constant dense<0.000000e+00> : vector<16x32xf32>
    %6 = tpu.matmul %4, %5, %cst {dimension_numbers = #tpu.dot_dimension_numbers<[1], [0], [0], [1], [0, 0, 1, 1], [], []>} : vector<16x32xf32>, vector<32x32xf32>, vector<16x32xf32> -> vector<16x32xf32>
    %c0_5 = arith.constant 0 : index
    %c0_6 = arith.constant 0 : index
    %7 = vector.load %arg7[%c0_5, %c0_6] : memref<1x32xf32, #tpu.memory_space<vmem>>, vector<1x32xf32>
    %8 = vector.broadcast %7 : vector<1x32xf32> to vector<16x32xf32>
    %9 = arith.addf %6, %8 : vector<16x32xf32>
    %c0_7 = arith.constant 0 : index
    %c0_8 = arith.constant 0 : index
    %10 = vector.load %arg11[%c0_7, %c0_8] : memref<2x32xf32, #tpu.memory_space<vmem>>, vector<2x32xf32>
    %11 = vector.shape_cast %9 : vector<16x32xf32> to vector<2x8x32xf32>
    %c0_9 = arith.constant 0 : index
    %c0_10 = arith.constant 0 : index
    %c0_11 = arith.constant 0 : index
    %12 = vector.load %arg9[%c0_9, %c0_10, %c0_11] : memref<2x8x32xf32, #tpu.memory_space<vmem>>, vector<2x8x32xf32>
    tpu.vector_store %arg9[%c0_9, %c0_10, %c0_11], %11 {strides = array<i32>} : memref<2x8x32xf32, #tpu.memory_space<vmem>>, vector<2x8x32xf32>,
    %13 = vector.shape_cast %10 : vector<2x32xf32> to vector<2x1x32xf32>
    %14 = vector.broadcast %13 : vector<2x1x32xf32> to vector<2x8x32xf32>
    %15 = arith.addf %14, %11 : vector<2x8x32xf32>
    %16 = math.tanh %15 : vector<2x8x32xf32>
    %c0_12 = arith.constant 0 : index
    %c0_13 = arith.constant 0 : index
    %17 = vector.load %arg8[%c0_12, %c0_13] : memref<1x32xf32, #tpu.memory_space<vmem>>, vector<1x32xf32>
    %18 = vector.shape_cast %17 : vector<1x32xf32> to vector<1x1x32xf32>
    %19 = vector.broadcast %18 : vector<1x1x32xf32> to vector<2x8x32xf32>
    %20 = arith.mulf %16, %19 : vector<2x8x32xf32>
    %cst_14 = arith.constant dense<0.000000e+00> : vector<2x8xf32>
    %21 = vector.multi_reduction <add>, %20, %cst_14 [2] : vector<2x8x32xf32> to vector<2x8xf32>
    %c0_15 = arith.constant 0 : index
    %c0_16 = arith.constant 0 : index
    %22 = vector.load %arg10[%c0_15, %c0_16] : memref<2x8xf32, #tpu.memory_space<vmem>>, vector<2x8xf32>
    tpu.vector_store %arg10[%c0_15, %c0_16], %21 {strides = array<i32>} : memref<2x8xf32, #tpu.memory_space<vmem>>, vector<2x8xf32>,
    return
  }
  func.func @transform_0(%arg0: i32, %arg1: i32) -> (i32, i32) {
    %c0_i32 = arith.constant 0 : i32
    %c0_i32_0 = arith.constant 0 : i32
    return %arg0, %c0_i32 : i32, i32
  }
  func.func @transform_1(%arg0: i32, %arg1: i32) -> (i32, i32, i32) {
    %c0_i32 = arith.constant 0 : i32
    %c0_i32_0 = arith.constant 0 : i32
    return %arg0, %arg1, %c0_i32 : i32, i32, i32
  }
  func.func @transform_2(%arg0: i32, %arg1: i32) -> (i32, i32) {
    %c0_i32 = arith.constant 0 : i32
    %c0_i32_0 = arith.constant 0 : i32
    %c0_i32_1 = arith.constant 0 : i32
    return %c0_i32, %c0_i32_0 : i32, i32
  }
  func.func @transform_3(%arg0: i32, %arg1: i32) -> (i32, i32) {
    %c0_i32 = arith.constant 0 : i32
    %c0_i32_0 = arith.constant 0 : i32
    %c0_i32_1 = arith.constant 0 : i32
    return %c0_i32, %c0_i32_0 : i32, i32
  }
  func.func @transform_4(%arg0: i32, %arg1: i32) -> (i32, i32) {
    %c0_i32 = arith.constant 0 : i32
    %c0_i32_0 = arith.constant 0 : i32
    %c0_i32_1 = arith.constant 0 : i32
    return %c0_i32, %c0_i32_0 : i32, i32
  }
  func.func @transform_5(%arg0: i32, %arg1: i32) -> (i32, i32) {
    %c0_i32 = arith.constant 0 : i32
    %c0_i32_0 = arith.constant 0 : i32
    %c0_i32_1 = arith.constant 0 : i32
    return %c0_i32, %c0_i32_0 : i32, i32
  }
  func.func @transform_6(%arg0: i32, %arg1: i32) -> (i32, i32) {
    %c0_i32 = arith.constant 0 : i32
    %c0_i32_0 = arith.constant 0 : i32
    %c0_i32_1 = arith.constant 0 : i32
    return %c0_i32, %c0_i32_0 : i32, i32
  }
  func.func @transform_7(%arg0: i32, %arg1: i32) -> (i32, i32, i32) {
    %c0_i32 = arith.constant 0 : i32
    %c0_i32_0 = arith.constant 0 : i32
    return %arg0, %arg1, %c0_i32 : i32, i32, i32
  }
  func.func @transform_8(%arg0: i32, %arg1: i32) -> (i32, i32) {
    %c0_i32 = arith.constant 0 : i32
    return %arg0, %arg1 : i32, i32
  }
}

</mosaic_0001>

<bundles_post_ra>
// kernel: tpu_custom_call.1
= control target key start
LH: loop header
LB: loop body
LE: loop exit
PB: predicated region body
PF: predicated region fallthrough
CT: control target
= control target key end

     0   :  { %14 = vsyncpa [#allocation4], 0  ;;  %s748_s0 = inlined_call_operand.hbm [shape: f32[2,32], index: 0, kind: input, shape index: {}]   ;;  %s749_s1 = inlined_call_operand.hbm [shape: f32[2,8,32], index: 1, kind: input, shape index: {}]   ;;  %s750_s2 = inlined_call_operand.hbm [shape: f32[32,32], index: 2, kind: input, shape index: {}]   ;;  %s751_s3 = inlined_call_operand.vmem [shape: f32[1,32], index: 3, kind: input, shape index: {}]   ;;  %s752_s4 = inlined_call_operand.hbm [shape: f32[32,32], index: 4, kind: input, shape index: {}]   ;;  %s753_s5 = inlined_call_operand.vmem [shape: f32[1,32], index: 5, kind: input, shape index: {}]   ;;  %s754_s6 = inlined_call_operand.vmem [shape: f32[1,32], index: 6, kind: input, shape index: {}]   ;;  %s755_s7 = inlined_call_operand.hbm [shape: f32[2,8,32], index: 7, kind: output, shape index: {0}]   ;;  %s756_s8 = inlined_call_operand.hbm [shape: f32[2,8], index: 8, kind: output, shape index: {1}]  }
   0x1   :  { %15 = vsyncpa [#allocation7], 0 }
   0x2   :  { %16 = vsyncpa [#allocation10], 0 }
   0x3   :  { %17 = vsyncpa [#allocation5], 0 }
   0x4   :  { %18 = vsyncpa [#allocation13], 0  ;;  %s587_s27 = smov [#allocation6]   ;;  %s445_s9 = scalar_lea.hbm %s749_s1, 256 }
   0x5   :  { %s34_s28 = sshll.u32 %s587_s27, 4  ;;  %p446_p0 = scmp.ne.s32.totalorder %s749_s1, %s445_s9  ;;  %s35_s28 = int_to_ptr.vmem [resolvable:$true] %s34_s28 }
   0x6   :  { %p449_p1 = scmp.lt.u32.totalorder %s445_s9, %s749_s1 }
   0x8   :  { %p451_p2 = pnand %p449_p1, %p446_p0 }
   0xa   :  { %454 = shalt.err (!%p451_p2)
}
   0xb   :  { %s455_s14 = scalar_lea.vmem %s35_s28, 256  ;;  %p460_p4 = scmp.lt.s32.totalorder %s35_s28, %s35_s28 }
   0xc   :  { %p456_p3 = scmp.ne.s32.totalorder %s35_s28, %s455_s14  ;;  %p461_p5 = scmp.lt.s32.totalorder %s455_s14, %s455_s14 }
   0xe   :  { %p462_p6 = por %p461_p5, %p460_p4 }
  0x10   :  { %p463_p7 = pnand %p462_p6, %p456_p3 }
  0x12   :  { %466 = shalt.err (!%p463_p7)
}
  0x13   :  { %s588_s15 = smov 128   ;;  %s589_s16 = smov 8  }
  0x14   :  { %40 = dma.hbm_to_vmem [thread:$0]  %s749_s1, 256, %s35_s28, [#allocation7], %s588_s15, %s588_s15, %s589_s16  }
  0x15   :  { %s590_s19 = smov [#allocation3]   ;;  %s591_s21 = smov [#allocation8]  }
  0x16   :  { %s25_s20 = sshll.u32 %s590_s19, 4  ;;  %s46_s22 = sshll.u32 %s591_s21, 4  ;;  %s26_s20 = int_to_ptr.vmem [resolvable:$true] %s25_s20  ;;  %s47_s22 = int_to_ptr.vmem [resolvable:$true] %s46_s22 }
  0x17   :  { %s467_s25 = scalar_lea.hbm %s748_s0, 32 }
  0x18   :  { %p468_p8 = scmp.ne.s32.totalorder %s748_s0, %s467_s25  ;;  %p471_p9 = scmp.lt.u32.totalorder %s467_s25, %s748_s0 }
  0x1a   :  { %p473_p10 = pnand %p471_p9, %p468_p8 }
  0x1c   :  { %476 = shalt.err (!%p473_p10)
}
  0x1d   :  { %s477_s1 = scalar_lea.vmem %s26_s20, 32  ;;  %p482_p12 = scmp.lt.s32.totalorder %s26_s20, %s26_s20 }
  0x1e   :  { %p478_p11 = scmp.ne.s32.totalorder %s26_s20, %s477_s1  ;;  %p483_p13 = scmp.lt.s32.totalorder %s477_s1, %s477_s1 }
  0x20   :  { %p484_p0 = por %p483_p13, %p482_p12 }
  0x22   :  { %p485_p1 = pnand %p484_p0, %p478_p11 }
  0x24   :  { %488 = shalt.err (!%p485_p1)
}
  0x25   :  { %28 = dma.hbm_to_vmem [thread:$0]  %s748_s0, 32, %s26_s20, [#allocation4]  }
  0x26   :  { %s489_s12 = scalar_lea.hbm %s750_s2, 512 }
  0x27   :  { %p490_p2 = scmp.ne.s32.totalorder %s750_s2, %s489_s12  ;;  %p493_p3 = scmp.lt.u32.totalorder %s489_s12, %s750_s2 }
  0x29   :  { %p495_p4 = pnand %p493_p3, %p490_p2 }
  0x2b   :  { %498 = shalt.err (!%p495_p4)
}
  0x2c   :  { %s499_s19 = scalar_lea.vmem %s47_s22, 512  ;;  %p504_p6 = scmp.lt.s32.totalorder %s47_s22, %s47_s22 }
  0x2d   :  { %p500_p5 = scmp.ne.s32.totalorder %s47_s22, %s499_s19  ;;  %p505_p7 = scmp.lt.s32.totalorder %s499_s19, %s499_s19 }
  0x2f   :  { %p506_p8 = por %p505_p7, %p504_p6 }
  0x31   :  { %p507_p9 = pnand %p506_p8, %p500_p5 }
  0x33   :  { %510 = shalt.err (!%p507_p9)
}
  0x34   :  { %52 = dma.hbm_to_vmem [thread:$0]  %s750_s2, 512, %s47_s22, [#allocation7], %s588_s15, %s588_s15, %s589_s16  }
  0x35   :  { %s592_s21 = smov [#allocation9]   ;;  %s511_s26 = scalar_lea.hbm %s752_s4, 512 }
  0x36   :  { %s60_s23 = sshll.u32 %s592_s21, 4  ;;  %p512_p10 = scmp.ne.s32.totalorder %s752_s4, %s511_s26  ;;  %s61_s23 = int_to_ptr.vmem [resolvable:$true] %s60_s23 }
  0x37   :  { %p515_p11 = scmp.lt.u32.totalorder %s511_s26, %s752_s4 }
  0x39   :  { %p517_p12 = pnand %p515_p11, %p512_p10 }
  0x3b   :  { %520 = shalt.err (!%p517_p12)
}
  0x3c   :  { %s521_s28 = scalar_lea.vmem %s61_s23, 512  ;;  %p526_p0 = scmp.lt.s32.totalorder %s61_s23, %s61_s23 }
  0x3d   :  { %p522_p13 = scmp.ne.s32.totalorder %s61_s23, %s521_s28  ;;  %p527_p1 = scmp.lt.s32.totalorder %s521_s28, %s521_s28 }
  0x3f   :  { %p528_p2 = por %p527_p1, %p526_p0 }
  0x41   :  { %p529_p3 = pnand %p528_p2, %p522_p13 }
  0x43   :  { %532 = shalt.err (!%p529_p3)
}
  0x44   :  { %66 = dma.hbm_to_vmem [thread:$0]  %s752_s4, 512, %s61_s23, [#allocation10], %s588_s15, %s588_s15, %s589_s16  }
  0x45   :  { %577 = dma.done.wait [#allocation4], 32  }
  0x46   :  { %578 = vsyncadd [#allocation4], 4294967264 }
  0x47   :  { %579 = dma.done.wait [#allocation7], 768  }
  0x48   :  { %580 = vsyncadd [#allocation7], 4294966528 }
  0x49   :  { %581 = dma.done.wait [#allocation10], 512  }
  0x4a   :  { %582 = vsyncadd [#allocation10], 4294966784  ;;  %v593_v0 = vmov 0.0|0.0   ;;  %vm594_vm0 = vmmov 0   ;;  %v595_v1 = vmov 0.0   ;;  %v88_v2 = vld [vmem:[#allocation8] sm:$0xff]  ;;  %v285_v17 = vlaneseq }
  0x4b   :  { %415 = vmatprep.subr.bf16.mxu0 %v593_v0  ;;  %401 = vmatprep.mubr.msk.f32.mxu0 %vm594_vm0, %v595_v1  ;;  %v89_v3 = vld [vmem:[#allocation8 + $0x8] sm:$0xff]  ;;  %v90_v4 = vld [vmem:[#allocation8 + $0x10] sm:$0xff]  ;;  %v91_v6 = vld [vmem:[#allocation8 + $0x18] sm:$0xff]  ;;  %vm99_vm1 = vcmask 261120   ;;  %v596_v22 = vmov 1966171168  }
  0x4c   :  { %v416_v5 = vpack.c.bf16 %v89_v3, %v88_v2  ;;  %v177_v7 = vld [vmem:[#allocation9] sm:$0xff]  ;;  %v178_v8 = vld [vmem:[#allocation9 + $0x8] sm:$0xff]  ;;  %v179_v9 = vld [vmem:[#allocation9 + $0x10] sm:$0xff]  ;;  %v419_v11 = vpack.c.bf16 %v91_v6, %v90_v4  ;;  %v286_v18 = vshrl.u32 %v285_v17, 7  ;;  %v328_v19 = vand.u32 127, %v285_v17  ;;  %s597_s12 = smov [#allocation11]  }
  0x4d   :  { %v180_v10 = vld [vmem:[#allocation9 + $0x18] sm:$0xff]  ;;  %v421_v12 = vpack.c.bf16 %v178_v8, %v177_v7  ;;  %v175_v14 = vld [vmem:[#allocation6] sm:$0xff]  ;;  %v87_v15 = vld [vmem:[#allocation3] sm:$0x3]  ;;  %v283_v23 = vunpack.c.l.s4 %v596_v22  ;;  %vm173_vm2 = vcmask 254976   ;;  %s347_s13 = sshll.u32 %s597_s12, 4  ;;  %s348_s13 = int_to_ptr.vmem [resolvable:$true] %s347_s13 }
  0x4e   :  { %417 = vmatpush3.bf16.msra.mxu0 %v416_v5  ;;  %v425_v13 = vpack.c.bf16 %v180_v10, %v179_v9  ;;  %412 = vmatprep.mubr.msk.f32.mxu1 %vm99_vm1, %v175_v14  ;;  %v176_v16 = vld [vmem:[#allocation6 + $0x8] sm:$0xff]  ;;  %v704_v20 = vsub.s32 %v328_v19, %v286_v18  ;;  %v375_v21 = vld [vmem:[%s751_s3] ss:$0 sm:$0xff]  ;;  %v298_v34 = vsub.s32 0, %v286_v18  ;;  %s533_s14 = scalar_lea.vmem %s348_s13, 256  ;;  %p538_p5 = scmp.lt.s32.totalorder %s348_s13, %s348_s13 }
  0x4f   :  { %418 = vmatprep.subr.bf16.mxu0 %v593_v0  ;;  %422 = vmatprep.subr.bf16.mxu1 %v421_v12  ;;  %v377_v27 = vld [vmem:[%s753_s5] ss:$0 sm:$0xff]  ;;  %v284_v29 = vunpack.c.0.s8 %v283_v23  ;;  %p534_p4 = scmp.ne.s32.totalorder %s348_s13, %s533_s14  ;;  %p539_p6 = scmp.lt.s32.totalorder %s533_s14, %s533_s14 }
  0x50   :  { %424 = vmatpush3.bf16.msra.mxu1 %v421_v12  ;;  %v381_v43 = vld [vmem:[%s754_s6] ss:$0 sm:$0xff] }
  0x51   :  { %426 = vmatprep.subr.bf16.mxu1 %v425_v13  ;;  %v287_v33 = vsub.s32 %v284_v29, %v286_v18  ;;  %p540_p7 = por %p539_p6, %p538_p5 }
  0x52   :  { %420 = vmatpush3.bf16.msra.mxu0 %v419_v11 }
  0x53   :  { %p541_p8 = pnand %p540_p7, %p534_p4 }
  0x54   :  { %428 = vmatpush3.bf16.msra.mxu1 %v425_v13 }
  0x55   :  { %402 = vmatmul.mubr.msk.f32.vlgmr.msra.gmra.mrb[0].mxu0 %vm99_vm1, %v87_v15 }
  0x57   :  { %413 = vmatmul.mubr.msk.f32.vlgmr.msra.gmra.mrb[0].mxu1 %vm99_vm1, %v176_v16 }
 0x128   :  { %v169_v24 = vpop.f32.mrb[0].mxu0 }
 0x129   :  { %v170_v25 = vadd.f32 %v375_v21, %v169_v24  ;;  %v403_v26 = vpop.f32.mrb[1].mxu0 }
 0x12a   :  { %v414_v28 = vpop.f32.mrb[0].mxu1 }
 0x12b   :  { %174 = vst.msk [vmem:[#allocation2] sm:$0x3] %vm173_vm2, %v170_v25  ;;  %v267_v30 = vadd.f32 %v414_v28, %v377_v27  ;;  %v261_v31 = vpop.f32.mrb[1].mxu1 }
 0x12c   :  { %v262_v32 = vadd.f32 %v377_v27, %v261_v31 }
 0x12d   :  { %272 = vst.msk [vmem:[#allocation11 + $0x8] sm:$0xff] %vm99_vm1, %v267_v30 }
 0x12e   :  { %271 = vst.msk [vmem:[#allocation11] sm:$0xff] %vm99_vm1, %v262_v32 }
 0x132   :  { %v380_v35 = vld.sshfl [vmem:[#allocation2] sm:$0x11 pattern:$0x75316420] }
 0x133   :  { %v281_v36 = vcombine.high %v380_v35, %v380_v35  ;;  %v288_v37 = vrot.slane %v380_v35, %v287_v33 }
 0x135   :  { %v295_v38 = vrot.slane %v281_v36, %v287_v33  ;;  %v299_v39 = vrot.slane %v288_v37, %v298_v34 }
 0x137   :  { %v303_v40 = vrot.slane %v295_v38, %v298_v34  ;;  %v306_v41 = vadd.f32 %v299_v39, %v262_v32 }
 0x139   :  { %v307_v42 = vadd.f32 %v303_v40, %v267_v30  ;;  %441 = vtanh.f32 %v306_v41 }
 0x13b   :  { %443 = vtanh.f32 %v307_v42 }
 0x143   :  { %v442_v44 = vpop.eup %441 }
 0x144   :  { %v317_v45 = vmul.f32 %v442_v44, %v381_v43 }
 0x145   :  { %v444_v46 = vpop.eup %443 }
 0x146   :  { %v319_v47 = vsel %vm99_vm1, %v317_v45, 0.0  ;;  %v318_v48 = vmul.f32 %v444_v46, %v381_v43 }
 0x147   :  { %320 = vadd.xlane.f32.xlu0 %v319_v47 }
 0x148   :  { %v322_v49 = vsel %vm99_vm1, %v318_v48, 0.0 }
 0x14b   :  { %323 = vadd.xlane.f32.xlu0 %v322_v49 }
 0x14c   :  { %544 = shalt.err (!%p541_p8)
}
 0x14d   :  { %s545_s18 = scalar_lea.hbm %s755_s7, 256 }
 0x14e   :  { %p546_p9 = scmp.ne.s32.totalorder %s755_s7, %s545_s18  ;;  %p549_p10 = scmp.lt.u32.totalorder %s545_s18, %s755_s7 }
 0x150   :  { %p551_p11 = pnand %p549_p10, %p546_p9 }
 0x152   :  { %554 = shalt.err (!%p551_p11)
}
 0x153   :  { %353 = dma.vmem_to_hbm [thread:$0]  %s348_s13, 256, %s755_s7, [#allocation5], %s588_s15, %s588_s15, %s589_s16   ;;  %vm337_vm3 = vcmask 1041409   ;;  %vm340_vm4 = vcmask 58368  }
 0x154   :  { %s598_s25 = smov [#allocation12]  }
 0x155   :  { %s360_s26 = sshll.u32 %s598_s25, 4  ;;  %s361_s26 = int_to_ptr.vmem [resolvable:$true] %s360_s26 }
 0x156   :  { %s555_s27 = scalar_lea.vmem %s361_s26, 32  ;;  %p560_p13 = scmp.lt.s32.totalorder %s361_s26, %s361_s26 }
 0x157   :  { %p556_p12 = scmp.ne.s32.totalorder %s361_s26, %s555_s27  ;;  %p561_p0 = scmp.lt.s32.totalorder %s555_s27, %s555_s27 }
 0x159   :  { %p562_p1 = por %p561_p0, %p560_p13 }
 0x15b   :  { %p563_p2 = pnand %p562_p1, %p556_p12 }
 0x1d4   :  { %v321_v50 = vpop.xlane.xlu0 %320 }
 0x1d5   :  { %v332_v52 = vrot.slane %v321_v50, %v704_v20 }
 0x1d8   :  { %v324_v51 = vpop.xlane.xlu0 %323 }
 0x1d9   :  { %v336_v53 = vrot.slane %v324_v51, %v704_v20 }
 0x1db   :  { %v338_v54 = vsel %vm337_vm3, %v336_v53, %v332_v52 }
 0x1dc   :  { %341 = vst.msk [vmem:[#allocation12] sm:$0x3] %vm340_vm4, %v338_v54 }
 0x1dd   :  { %566 = shalt.err (!%p563_p2)
}
 0x1de   :  { %s567_s16 = scalar_lea.hbm %s756_s8, 32 }
 0x1df   :  { %p568_p3 = scmp.ne.s32.totalorder %s756_s8, %s567_s16  ;;  %p571_p4 = scmp.lt.u32.totalorder %s567_s16, %s756_s8 }
 0x1e1   :  { %p573_p5 = pnand %p571_p4, %p568_p3 }
 0x1e3   :  { %576 = shalt.err (!%p573_p5)
}
 0x1e4   :  { %363 = dma.vmem_to_hbm [thread:$0]  %s361_s26, 32, %s756_s8, [#allocation13]  }
 0x1e5   :  { %583 = dma.done.wait [#allocation5], 256  }
 0x1e6   :  { %584 = vsyncadd [#allocation5], 4294967040 }
 0x1e7   :  { %585 = dma.done.wait [#allocation13], 32  }
 0x1e8   :  { %586 = vsyncadd [#allocation13], 4294967264 }
 0x1e9   :  { %370 = vsyncpa [#allocation4], 1 }
 0x1ea   :  { %371 = vsyncpa [#allocation7], 1 }
 0x1eb   :  { %372 = vsyncpa [#allocation10], 1 }
 0x1ec   :  { %373 = vsyncpa [#allocation5], 1 }
 0x1ed   :  { %374 = vsyncpa [#allocation13], 1 }

</bundles_post_ra>
